<compile_context>
chip_gen: v7x
topology: tpu7x:2x2x1
jax: 0.10.0
libtpu: 0.0.40
codegen_flags: <defaults>
</compile_context>

<pallas_src>
import math
import functools

import jax
import jax.numpy as jnp
from jax.experimental import pallas as pl
from jax.experimental.pallas import tpu as pltpu


def make_positional_encoding(d_model: int, seq_len: int,
                             dtype=jnp.float32) -> jnp.ndarray:
    """Build the (1, seq_len, d_model) sin/cos buffer exactly as the module does."""
    position = jnp.arange(seq_len, dtype=jnp.float32)[:, None]           # (S, 1)
    div_term = jnp.exp(
        jnp.arange(0, d_model, 2, dtype=jnp.float32) * (-math.log(10000.0) / d_model)
    )                                                                     # (d_model//2,)
    angles = position / div_term                                          # (S, d_model//2)
    pe = jnp.zeros((seq_len, d_model), jnp.float32)
    pe = pe.at[:, 0::2].set(jnp.sin(angles))
    pe = pe.at[:, 1::2].set(jnp.cos(angles))
    return pe[None, :, :].astype(dtype)                                   # (1, S, d_model)


def _pos_enc_kernel(x_ref, pe_ref, o_ref):
    # x_ref/o_ref: (B, tS, D) slab; pe_ref: (1, tS, D) broadcast over batch.
    # Pure VPU elementwise add; no slices, no transposes, no relayouts.
    o_ref[...] = (x_ref[...] + pe_ref[...]).astype(o_ref.dtype)


# ~2 MiB per x slab -> with double-buffered x / pe / out the pipeline stays
# well under even v5e's 16 MiB scoped-VMEM default, while each grid step moves
# enough bytes to amortize the fixed per-step overhead.
_TILE_BYTES = 2 * 1024 * 1024


@functools.partial(jax.jit, static_argnames=("row_tile", "inplace"))
def positional_encoding(x, pe, *, row_tile=None, inplace=False):
    """x: [B, S, D]; pe: [1, seq_len, D] registered buffer with seq_len >= S."""
    B, S, D = x.shape
    assert pe.shape[0] == 1 and pe.shape[2] == D and pe.shape[1] >= S

    itemsize = jnp.dtype(x.dtype).itemsize
    sublane = {4: 8, 2: 16, 1: 32}.get(itemsize, 8)

    if row_tile is None:
        # VMEM-budget-driven sequence tile (rounded down to the sublane multiple).
        tS = max(_TILE_BYTES // max(B * D * itemsize, 1), sublane)
        tS -= tS % sublane
    else:
        tS = int(row_tile)

    if tS >= S:
        tS = S  # block dim == full array dim is always a legal block shape
    elif tS % sublane != 0:
        raise ValueError(
            f"row_tile={tS} must be a multiple of {sublane} for dtype {x.dtype} "
            f"(or >= the sequence length {S}).")

    n_s = pl.cdiv(S, tS)  # ragged last block is masked by Pallas

    # Batch folded into the block; single "parallel" sequence-tile grid axis.
    x_spec = pl.BlockSpec((B, tS, D), lambda s: (0, s, 0))
    pe_spec = pl.BlockSpec((1, tS, D), lambda s: (0, s, 0))  # each row DMA'd once

    return pl.pallas_call(
        _pos_enc_kernel,
        out_shape=jax.ShapeDtypeStruct((B, S, D), x.dtype),
        grid_spec=pltpu.PrefetchScalarGridSpec(
            num_scalar_prefetch=0,
            grid=(n_s,),
            in_specs=[x_spec, pe_spec],
            out_specs=x_spec,
        ),
        input_output_aliases={0: 0} if inplace else {},
        compiler_params=pltpu.CompilerParams(
            dimension_semantics=("parallel",),
            vmem_limit_bytes=32 * 1024 * 1024,
        ),
    )(x, pe)


def _reference(x, pe):
    """Pure-JAX reference matching the PyTorch module semantics (eval mode)."""
    S = x.shape[1]
    return x + pe[:, :S, :]


if __name__ == "__main__":
    # Small shapes consistent with the module; d_model is a multiple of 128 so
    # every vector op is lane-dense.
    B, REG_SEQ_LEN, D_MODEL = 2, 64, 128

    pe = make_positional_encoding(D_MODEL, REG_SEQ_LEN)

    key = jax.random.PRNGKey(0)

    # Case 1: S=16, default (budget-derived) tile -> single big slab.
    x = jax.random.normal(key, (B, 16, D_MODEL), jnp.float32)
    out = jax.block_until_ready(positional_encoding(x, pe))
    assert out.shape == x.shape
    assert jnp.allclose(out, _reference(x, pe), atol=1e-6, rtol=1e-6)

    # Case 2: explicit sequence tiling (n_s > 1), pe fetched once per tile.
    x2 = jax.random.normal(jax.random.PRNGKey(1), (B, 48, D_MODEL), jnp.float32)
    out2 = jax.block_until_ready(positional_encoding(x2, pe, row_tile=16))
    assert jnp.allclose(out2, _reference(x2, pe), atol=1e-6, rtol=1e-6)

    # Case 3: ragged last sequence tile (40 rows with 16-row tiles -> cdiv=3).
    x3 = jax.random.normal(jax.random.PRNGKey(2), (B, 40, D_MODEL), jnp.float32)
    out3 = jax.block_until_ready(positional_encoding(x3, pe, row_tile=16))
    assert jnp.allclose(out3, _reference(x3, pe), atol=1e-6, rtol=1e-6)

    print("KERNEL_OK")
</pallas_src>

<mosaic_0001>
module attributes {stable_mosaic.version = 11 : i64} {
  func.func @_pos_enc_kernel(%arg0: i32, %arg1: memref<2x16x128xf32, #tpu.memory_space<vmem>>, %arg2: memref<1x16x128xf32, #tpu.memory_space<vmem>>, %arg3: memref<2x16x128xf32, #tpu.memory_space<vmem>>) attributes {dimension_semantics = [#tpu.dimension_semantics<parallel>], iteration_bounds = array<i64: 1>, scalar_prefetch = 0 : i64, scratch_operands = 0 : i64, tpu.core_type = #tpu.core_type<tc>, window_params = [{transform_indices = @transform_0, window_bounds = array<i64: 2, 16, 128>}, {transform_indices = @transform_1, window_bounds = array<i64: 1, 16, 128>}, {transform_indices = @transform_2, window_bounds = array<i64: 2, 16, 128>}]} {
    %c0 = arith.constant 0 : index
    %c0_0 = arith.constant 0 : index
    %c0_1 = arith.constant 0 : index
    %0 = vector.load %arg1[%c0, %c0_0, %c0_1] : memref<2x16x128xf32, #tpu.memory_space<vmem>>, vector<2x16x128xf32>
    %c0_2 = arith.constant 0 : index
    %c0_3 = arith.constant 0 : index
    %c0_4 = arith.constant 0 : index
    %1 = vector.load %arg2[%c0_2, %c0_3, %c0_4] : memref<1x16x128xf32, #tpu.memory_space<vmem>>, vector<1x16x128xf32>
    %2 = vector.broadcast %1 : vector<1x16x128xf32> to vector<2x16x128xf32>
    %3 = arith.addf %0, %2 : vector<2x16x128xf32>
    %c0_5 = arith.constant 0 : index
    %c0_6 = arith.constant 0 : index
    %c0_7 = arith.constant 0 : index
    %4 = vector.load %arg3[%c0_5, %c0_6, %c0_7] : memref<2x16x128xf32, #tpu.memory_space<vmem>>, vector<2x16x128xf32>
    tpu.vector_store %arg3[%c0_5, %c0_6, %c0_7], %3 {strides = array<i32>} : memref<2x16x128xf32, #tpu.memory_space<vmem>>, vector<2x16x128xf32>,
    return
  }
  func.func @transform_0(%arg0: i32) -> (i32, i32, i32) {
    %c0_i32 = arith.constant 0 : i32
    %c0_i32_0 = arith.constant 0 : i32
    %c0_i32_1 = arith.constant 0 : i32
    return %c0_i32, %arg0, %c0_i32_0 : i32, i32, i32
  }
  func.func @transform_1(%arg0: i32) -> (i32, i32, i32) {
    %c0_i32 = arith.constant 0 : i32
    %c0_i32_0 = arith.constant 0 : i32
    %c0_i32_1 = arith.constant 0 : i32
    return %c0_i32, %arg0, %c0_i32_0 : i32, i32, i32
  }
  func.func @transform_2(%arg0: i32) -> (i32, i32, i32) {
    %c0_i32 = arith.constant 0 : i32
    %c0_i32_0 = arith.constant 0 : i32
    %c0_i32_1 = arith.constant 0 : i32
    return %c0_i32, %arg0, %c0_i32_0 : i32, i32, i32
  }
}

</mosaic_0001>

<bundles_post_ra>
// kernel: positional_encoding.1
= control target key start
LH: loop header
LB: loop body
LE: loop exit
PB: predicated region body
PF: predicated region fallthrough
CT: control target
= control target key end

     0   :  { %7 = vsyncpa [#allocation3], 0  ;;  %s217_s0 = inlined_call_operand.hbm [shape: f32[2,16,128], index: 0, kind: input, shape index: {}]   ;;  %s218_s1 = inlined_call_operand.hbm [shape: f32[1,64,128], index: 1, kind: input, shape index: {}]   ;;  %s219_s2 = inlined_call_operand.hbm [shape: f32[2,16,128], index: 2, kind: output, shape index: {}]  }
   0x1   :  { %8 = vsyncpa [#allocation6], 0 }
   0x2   :  { %9 = vsyncpa [#allocation4], 0  ;;  %s149_s9 = smov [#allocation2]   ;;  %s77_s13 = scalar_lea.hbm %s217_s0, 512 }
   0x3   :  { %s15_s10 = sshll.u32 %s149_s9, 4  ;;  %p78_p0 = scmp.ne.s32.totalorder %s217_s0, %s77_s13  ;;  %s16_s10 = int_to_ptr.vmem [resolvable:$true] %s15_s10 }
   0x4   :  { %p81_p1 = scmp.lt.u32.totalorder %s77_s13, %s217_s0 }
   0x6   :  { %p83_p2 = pnand %p81_p1, %p78_p0 }
   0x8   :  { %86 = shalt.err (!%p83_p2)
}
   0x9   :  { %s87_s18 = scalar_lea.vmem %s16_s10, 512  ;;  %p92_p4 = scmp.lt.s32.totalorder %s16_s10, %s16_s10 }
   0xa   :  { %p88_p3 = scmp.ne.s32.totalorder %s16_s10, %s87_s18  ;;  %p93_p5 = scmp.lt.s32.totalorder %s87_s18, %s87_s18 }
   0xc   :  { %p94_p6 = por %p93_p5, %p92_p4 }
   0xe   :  { %p95_p7 = pnand %p94_p6, %p88_p3 }
  0x10   :  { %98 = shalt.err (!%p95_p7)
}
  0x11   :  { %s150_s19 = smov 128   ;;  %s151_s20 = smov 8  }
  0x12   :  { %21 = dma.hbm_to_vmem [thread:$0]  %s217_s0, 512, %s16_s10, [#allocation3], %s150_s19, %s150_s19, %s151_s20  }
  0x13   :  { %s152_s23 = smov [#allocation5]   ;;  %s99_s27 = scalar_lea.hbm %s218_s1, 256 }
  0x14   :  { %s27_s24 = sshll.u32 %s152_s23, 4  ;;  %p100_p8 = scmp.ne.s32.totalorder %s218_s1, %s99_s27  ;;  %s28_s24 = int_to_ptr.vmem [resolvable:$true] %s27_s24 }
  0x15   :  { %s101_s4 = scalar_lea.hbm %s218_s1, 1024  ;;  %p103_p10 = scmp.lt.u32.totalorder %s99_s27, %s218_s1 }
  0x16   :  { %p102_p9 = scmp.lt.u32.totalorder %s101_s4, %s99_s27 }
  0x18   :  { %p104_p11 = por %p103_p10, %p102_p9 }
  0x1a   :  { %p105_p12 = pnand %p104_p11, %p100_p8 }
  0x1c   :  { %108 = shalt.err (!%p105_p12)
}
  0x1d   :  { %s109_s0 = scalar_lea.vmem %s28_s24, 256  ;;  %p114_p0 = scmp.lt.s32.totalorder %s28_s24, %s28_s24 }
  0x1e   :  { %p110_p13 = scmp.ne.s32.totalorder %s28_s24, %s109_s0  ;;  %p115_p1 = scmp.lt.s32.totalorder %s109_s0, %s109_s0 }
  0x20   :  { %p116_p2 = por %p115_p1, %p114_p0 }
  0x22   :  { %p117_p3 = pnand %p116_p2, %p110_p13 }
  0x24   :  { %120 = shalt.err (!%p117_p3)
}
  0x25   :  { %33 = dma.hbm_to_vmem [thread:$0]  %s218_s1, 256, %s28_s24, [#allocation6], %s150_s19, %s150_s19, %s151_s20  }
  0x26   :  { %143 = dma.done.wait [#allocation3], 512  }
  0x27   :  { %144 = vsyncadd [#allocation3], 4294966784 }
  0x28   :  { %145 = dma.done.wait [#allocation6], 256  }
  0x29   :  { %146 = vsyncadd [#allocation6], 4294967040  ;;  %s153_s9 = smov [#allocation7]   ;;  %v40_v0 = vld [vmem:[#allocation2] sm:$0xff]  ;;  %v41_v2 = vld [vmem:[#allocation2 + $0x8] sm:$0xff] }
  0x2a   :  { %s59_s10 = sshll.u32 %s153_s9, 4  ;;  %v44_v1 = vld [vmem:[#allocation5] sm:$0xff]  ;;  %v45_v4 = vld [vmem:[#allocation5 + $0x8] sm:$0xff]  ;;  %v42_v5 = vld [vmem:[#allocation2 + $0x10] sm:$0xff]  ;;  %s60_s10 = int_to_ptr.vmem [resolvable:$true] %s59_s10 }
  0x2b   :  { %v46_v3 = vadd.f32 %v44_v1, %v40_v0  ;;  %v43_v6 = vld [vmem:[#allocation2 + $0x18] sm:$0xff]  ;;  %v47_v7 = vadd.f32 %v45_v4, %v41_v2  ;;  %v48_v8 = vadd.f32 %v44_v1, %v42_v5  ;;  %s121_s1 = scalar_lea.vmem %s60_s10, 512  ;;  %p126_p5 = scmp.lt.s32.totalorder %s60_s10, %s60_s10 }
  0x2c   :  { %v49_v9 = vadd.f32 %v45_v4, %v43_v6  ;;  %p122_p4 = scmp.ne.s32.totalorder %s60_s10, %s121_s1  ;;  %p127_p6 = scmp.lt.s32.totalorder %s121_s1, %s121_s1 }
  0x2d   :  { %50 = vst [vmem:[#allocation7] sm:$0xff] %v46_v3  ;;  %51 = vst [vmem:[#allocation7 + $0x8] sm:$0xff] %v47_v7 }
  0x2e   :  { %52 = vst [vmem:[#allocation7 + $0x10] sm:$0xff] %v48_v8  ;;  %53 = vst [vmem:[#allocation7 + $0x18] sm:$0xff] %v49_v9  ;;  %p128_p7 = por %p127_p6, %p126_p5 }
  0x30   :  { %p129_p8 = pnand %p128_p7, %p122_p4 }
  0x32   :  { %132 = shalt.err (!%p129_p8)
}
  0x33   :  { %s133_s13 = scalar_lea.hbm %s219_s2, 512 }
  0x34   :  { %p134_p9 = scmp.ne.s32.totalorder %s219_s2, %s133_s13  ;;  %p137_p10 = scmp.lt.u32.totalorder %s133_s13, %s219_s2 }
  0x36   :  { %p139_p11 = pnand %p137_p10, %p134_p9 }
  0x38   :  { %142 = shalt.err (!%p139_p11)
}
  0x39   :  { %65 = dma.vmem_to_hbm [thread:$0]  %s60_s10, 512, %s219_s2, [#allocation4], %s150_s19, %s150_s19, %s151_s20  }
  0x3a   :  { %147 = dma.done.wait [#allocation4], 512  }
  0x3b   :  { %148 = vsyncadd [#allocation4], 4294966784 }
  0x3c   :  { %69 = vsyncpa [#allocation3], 1 }
  0x3d   :  { %70 = vsyncpa [#allocation6], 1 }
  0x3e   :  { %71 = vsyncpa [#allocation4], 1 }

</bundles_post_ra>
